<compile_context>
chip_gen: v6e
topology: v6e:2x2x1
jax: 0.10.0
libtpu: 0.0.40
codegen_flags: <defaults>
</compile_context>

<pallas_src>
import functools
import math

import jax
import jax.numpy as jnp
from jax import lax
from jax.experimental import pallas as pl
from jax.experimental.pallas import tpu as pltpu

_LANE = 128
_SUBLANE = 8


def _round_up(x, m):
    return ((x + m - 1) // m) * m


def _ffn_kernel(x_ref, w1_ref, b1_ref, g_ref, beta_ref, w2_ref, b2_ref, o_ref,
                *, inter_true, eps):
    # fc1 on the MXU: operands keep their (possibly bf16) dtype, f32 accumulation.
    h = jnp.dot(x_ref[...], w1_ref[...], preferred_element_type=jnp.float32)
    h = h + b1_ref[...].astype(jnp.float32)

    # GELU (erf form), f32.
    h = h * 0.5 * (1.0 + lax.erf(h * (1.0 / math.sqrt(2.0))))

    # LayerNorm over the TRUE intermediate width (biased variance, eps like torch).
    # Padded columns of h are exactly 0 (zero-padded w1 columns / b1 entries and
    # gelu(0) == 0), so sums over the padded tile equal sums over the true width.
    inter_pad = h.shape[-1]
    inv_n = 1.0 / float(inter_true)
    mean = jnp.sum(h, axis=-1, keepdims=True) * inv_n
    diff = h - mean
    if inter_pad != inter_true:
        col = lax.broadcasted_iota(jnp.int32, diff.shape, dimension=1)
        diff = jnp.where(col < inter_true, diff, 0.0)   # exact torch-style variance
    var = jnp.sum(diff * diff, axis=-1, keepdims=True) * inv_n
    h = diff * lax.rsqrt(var + eps)
    # gamma/beta are zero-padded -> padded columns come out as exactly 0.
    h = h * g_ref[...].astype(jnp.float32) + beta_ref[...].astype(jnp.float32)

    # fc2 on the MXU: operands in the weight dtype, f32 accumulation.
    out = jnp.dot(h.astype(w2_ref.dtype), w2_ref[...],
                  preferred_element_type=jnp.float32)
    out = out + b2_ref[...].astype(jnp.float32)
    o_ref[...] = out.astype(o_ref.dtype)


def ffn_layer(x, w1, b1, gamma, beta, w2, b2, *, tile_rows=256, eps=1e-5,
              matmul_dtype=None):
    """x: [N, input_dim]; w1: [input_dim, inter]; w2: [inter, output_dim];
    b1/gamma/beta: [inter] or [1, inter]; b2: [output_dim] or [1, output_dim].
    matmul_dtype: dtype for MXU operands (default: x.dtype, e.g. pass bf16)."""
    N, input_dim = x.shape
    inter = w1.shape[1]
    output_dim = w2.shape[1]
    out_dtype = x.dtype
    matmul_dtype = jnp.dtype(matmul_dtype) if matmul_dtype is not None else x.dtype

    # Lane-dense padding: feature dims -> multiples of 128, rows -> row tile.
    d_in = _round_up(input_dim, _LANE)
    d_mid = _round_up(inter, _LANE)
    d_out = _round_up(output_dim, _LANE)
    tile_rows = min(_round_up(tile_rows, _SUBLANE), _round_up(N, _SUBLANE))
    n_rows = _round_up(N, tile_rows)
    grid = (n_rows // tile_rows,)

    x_p = jnp.pad(x, ((0, n_rows - N), (0, d_in - input_dim))).astype(matmul_dtype)
    w1_p = jnp.pad(w1, ((0, d_in - input_dim), (0, d_mid - inter))).astype(matmul_dtype)
    w2_p = jnp.pad(w2, ((0, d_mid - inter), (0, d_out - output_dim))).astype(matmul_dtype)
    b1_p = jnp.pad(jnp.reshape(b1, (1, -1)).astype(jnp.float32),
                   ((0, 0), (0, d_mid - inter)))
    g_p = jnp.pad(jnp.reshape(gamma, (1, -1)).astype(jnp.float32),
                  ((0, 0), (0, d_mid - inter)))
    beta_p = jnp.pad(jnp.reshape(beta, (1, -1)).astype(jnp.float32),
                     ((0, 0), (0, d_mid - inter)))
    b2_p = jnp.pad(jnp.reshape(b2, (1, -1)).astype(jnp.float32),
                   ((0, 0), (0, d_out - output_dim)))

    # Grid-invariant operands (constant index_map): single-buffer them.
    def _const_spec(shape):
        return pl.BlockSpec(shape, lambda i: (0, 0),
                            pipeline_mode=pl.Buffered(buffer_count=1))

    w_bytes = jnp.dtype(matmul_dtype).itemsize
    cost = pl.CostEstimate(
        flops=2 * n_rows * d_mid * (d_in + d_out),
        transcendentals=n_rows * d_mid,  # erf
        bytes_accessed=(n_rows * d_in * w_bytes
                        + d_in * d_mid * w_bytes
                        + d_mid * d_out * w_bytes
                        + (3 * d_mid + d_out) * 4
                        + n_rows * d_out * jnp.dtype(out_dtype).itemsize),
    )

    kernel = functools.partial(_ffn_kernel, inter_true=inter, eps=eps)

    out_padded = pl.pallas_call(
        kernel,
        out_shape=jax.ShapeDtypeStruct((n_rows, d_out), out_dtype),
        grid_spec=pltpu.PrefetchScalarGridSpec(
            num_scalar_prefetch=0,
            grid=grid,
            in_specs=[
                pl.BlockSpec((tile_rows, d_in), lambda i: (i, 0)),  # x row tile
                _const_spec((d_in, d_mid)),                         # w1 (resident)
                _const_spec((1, d_mid)),                            # b1
                _const_spec((1, d_mid)),                            # ln gamma
                _const_spec((1, d_mid)),                            # ln beta
                _const_spec((d_mid, d_out)),                        # w2 (resident)
                _const_spec((1, d_out)),                            # b2
            ],
            out_specs=pl.BlockSpec((tile_rows, d_out), lambda i: (i, 0)),
        ),
        compiler_params=pltpu.CompilerParams(
            dimension_semantics=("parallel",),
            # Resident weights + large row tiles exceed the default scoped VMEM
            # limit (16 MiB v5e / 32 MiB v6e,v7x) at real transformer sizes.
            vmem_limit_bytes=64 * 1024 * 1024,
        ),
        cost_estimate=cost,
    )(x_p, w1_p, b1_p, g_p, beta_p, w2_p, b2_p)

    return out_padded[:N, :output_dim]


if __name__ == "__main__":
    # Small shapes consistent with the module: batch=2, seq=8 -> 16 token rows.
    batch, seq = 2, 8
    input_dim, intermediate_dim, output_dim = 32, 64, 32
    N = batch * seq

    key = jax.random.PRNGKey(0)
    kx, kw1, kb1, kw2, kb2 = jax.random.split(key, 5)

    x = jax.random.normal(kx, (N, input_dim), dtype=jnp.float32)

    # Deterministic parameter init (Linear: weight [out, in], passed as [in, out]).
    w1 = (jax.random.normal(kw1, (input_dim, intermediate_dim), dtype=jnp.float32)
          * (1.0 / math.sqrt(input_dim)))
    b1 = jax.random.normal(kb1, (1, intermediate_dim), dtype=jnp.float32) * 0.01
    gamma = jnp.ones((1, intermediate_dim), dtype=jnp.float32)   # LayerNorm weight
    beta = jnp.zeros((1, intermediate_dim), dtype=jnp.float32)   # LayerNorm bias
    w2 = (jax.random.normal(kw2, (intermediate_dim, output_dim), dtype=jnp.float32)
          * (1.0 / math.sqrt(intermediate_dim)))
    b2 = jax.random.normal(kb2, (1, output_dim), dtype=jnp.float32) * 0.01

    out = ffn_layer(x, w1, b1, gamma, beta, w2, b2)
    jax.block_until_ready(out)

    # Pure-JAX reference check (dropout is identity at inference).
    h_ref = x @ w1 + b1
    h_ref = h_ref * 0.5 * (1.0 + lax.erf(h_ref / math.sqrt(2.0)))
    mu = jnp.mean(h_ref, axis=-1, keepdims=True)
    var = jnp.mean((h_ref - mu) ** 2, axis=-1, keepdims=True)
    h_ref = (h_ref - mu) / jnp.sqrt(var + 1e-5) * gamma + beta
    ref = h_ref @ w2 + b2
    assert jnp.allclose(out, ref, atol=1e-4, rtol=1e-4), "mismatch vs reference"

    # TODO(synk): training-mode dropout (stochastic mask) not implemented; eval-mode identity used.
    print("KERNEL_OK")
</pallas_src>

<mosaic_0001>
module attributes {stable_mosaic.version = 11 : i64} {
  func.func @_ffn_kernel(%arg0: i32, %arg1: memref<16x128xf32, #tpu.memory_space<vmem>>, %arg2: memref<128x128xf32, #tpu.memory_space<vmem>>, %arg3: memref<1x128xf32, #tpu.memory_space<vmem>>, %arg4: memref<1x128xf32, #tpu.memory_space<vmem>>, %arg5: memref<1x128xf32, #tpu.memory_space<vmem>>, %arg6: memref<128x128xf32, #tpu.memory_space<vmem>>, %arg7: memref<1x128xf32, #tpu.memory_space<vmem>>, %arg8: memref<16x128xf32, #tpu.memory_space<vmem>>) attributes {dimension_semantics = [#tpu.dimension_semantics<parallel>], iteration_bounds = array<i64: 1>, scalar_prefetch = 0 : i64, scratch_operands = 0 : i64, tpu.core_type = #tpu.core_type<tc>, window_params = [{transform_indices = @transform_0, window_bounds = array<i64: 16, 128>}, {pipeline_mode = #tpu.pipeline_mode<synchronous>, transform_indices = @transform_1, window_bounds = array<i64: 128, 128>}, {pipeline_mode = #tpu.pipeline_mode<synchronous>, transform_indices = @transform_2, window_bounds = array<i64: 1, 128>}, {pipeline_mode = #tpu.pipeline_mode<synchronous>, transform_indices = @transform_3, window_bounds = array<i64: 1, 128>}, {pipeline_mode = #tpu.pipeline_mode<synchronous>, transform_indices = @transform_4, window_bounds = array<i64: 1, 128>}, {pipeline_mode = #tpu.pipeline_mode<synchronous>, transform_indices = @transform_5, window_bounds = array<i64: 128, 128>}, {pipeline_mode = #tpu.pipeline_mode<synchronous>, transform_indices = @transform_6, window_bounds = array<i64: 1, 128>}, {transform_indices = @transform_7, window_bounds = array<i64: 16, 128>}]} {
    %c0 = arith.constant 0 : index
    %c0_0 = arith.constant 0 : index
    %0 = vector.load %arg1[%c0, %c0_0] : memref<16x128xf32, #tpu.memory_space<vmem>>, vector<16x128xf32>
    %c0_1 = arith.constant 0 : index
    %c0_2 = arith.constant 0 : index
    %1 = vector.load %arg2[%c0_1, %c0_2] : memref<128x128xf32, #tpu.memory_space<vmem>>, vector<128x128xf32>
    %cst = arith.constant dense<0.000000e+00> : vector<16x128xf32>
    %2 = tpu.matmul %0, %1, %cst {dimension_numbers = #tpu.dot_dimension_numbers<[1], [0], [0], [1], [0, 0, 1, 1], [], []>} : vector<16x128xf32>, vector<128x128xf32>, vector<16x128xf32> -> vector<16x128xf32>
    %c0_3 = arith.constant 0 : index
    %c0_4 = arith.constant 0 : index
    %3 = vector.load %arg3[%c0_3, %c0_4] : memref<1x128xf32, #tpu.memory_space<vmem>>, vector<1x128xf32>
    %4 = vector.broadcast %3 : vector<1x128xf32> to vector<16x128xf32>
    %5 = arith.addf %2, %4 : vector<16x128xf32>
    %cst_5 = arith.constant 5.000000e-01 : f32
    %6 = vector.broadcast %cst_5 : f32 to vector<16x128xf32>
    %7 = arith.mulf %5, %6 : vector<16x128xf32>
    %cst_6 = arith.constant 0.707106769 : f32
    %8 = vector.broadcast %cst_6 : f32 to vector<16x128xf32>
    %9 = arith.mulf %5, %8 : vector<16x128xf32>
    %10 = math.erf %9 : vector<16x128xf32>
    %cst_7 = arith.constant 1.000000e+00 : f32
    %11 = vector.broadcast %cst_7 : f32 to vector<16x128xf32>
    %12 = arith.addf %11, %10 : vector<16x128xf32>
    %13 = arith.mulf %7, %12 : vector<16x128xf32>
    %cst_8 = arith.constant dense<0.000000e+00> : vector<16xf32>
    %14 = vector.multi_reduction <add>, %13, %cst_8 [1] : vector<16x128xf32> to vector<16xf32>
    %15 = vector.shape_cast %14 : vector<16xf32> to vector<16x1xf32>
    %cst_9 = arith.constant 1.562500e-02 : f32
    %16 = vector.broadcast %cst_9 : f32 to vector<16x1xf32>
    %17 = arith.mulf %15, %16 : vector<16x1xf32>
    %18 = vector.broadcast %17 : vector<16x1xf32> to vector<16x128xf32>
    %19 = arith.subf %13, %18 : vector<16x128xf32>
    %20 = tpu.iota {dimensions = array<i32: 1>} : vector<16x128xi32>
    %c64_i32 = arith.constant 64 : i32
    %21 = vector.broadcast %c64_i32 : i32 to vector<16x128xi32>
    %22 = arith.cmpi slt, %20, %21 : vector<16x128xi32>
    %cst_10 = arith.constant 0.000000e+00 : f32
    %23 = vector.broadcast %cst_10 : f32 to vector<16x128xf32>
    %24 = arith.select %22, %19, %23 : vector<16x128xi1>, vector<16x128xf32>
    %25 = arith.mulf %24, %24 : vector<16x128xf32>
    %cst_11 = arith.constant dense<0.000000e+00> : vector<16xf32>
    %26 = vector.multi_reduction <add>, %25, %cst_11 [1] : vector<16x128xf32> to vector<16xf32>
    %27 = vector.shape_cast %26 : vector<16xf32> to vector<16x1xf32>
    %cst_12 = arith.constant 1.562500e-02 : f32
    %28 = vector.broadcast %cst_12 : f32 to vector<16x1xf32>
    %29 = arith.mulf %27, %28 : vector<16x1xf32>
    %cst_13 = arith.constant 9.99999974E-6 : f32
    %30 = vector.broadcast %cst_13 : f32 to vector<16x1xf32>
    %31 = arith.addf %29, %30 : vector<16x1xf32>
    %32 = math.rsqrt %31 : vector<16x1xf32>
    %33 = vector.broadcast %32 : vector<16x1xf32> to vector<16x128xf32>
    %34 = arith.mulf %24, %33 : vector<16x128xf32>
    %c0_14 = arith.constant 0 : index
    %c0_15 = arith.constant 0 : index
    %35 = vector.load %arg4[%c0_14, %c0_15] : memref<1x128xf32, #tpu.memory_space<vmem>>, vector<1x128xf32>
    %36 = vector.broadcast %35 : vector<1x128xf32> to vector<16x128xf32>
    %37 = arith.mulf %34, %36 : vector<16x128xf32>
    %c0_16 = arith.constant 0 : index
    %c0_17 = arith.constant 0 : index
    %38 = vector.load %arg5[%c0_16, %c0_17] : memref<1x128xf32, #tpu.memory_space<vmem>>, vector<1x128xf32>
    %39 = vector.broadcast %38 : vector<1x128xf32> to vector<16x128xf32>
    %40 = arith.addf %37, %39 : vector<16x128xf32>
    %c0_18 = arith.constant 0 : index
    %c0_19 = arith.constant 0 : index
    %41 = vector.load %arg6[%c0_18, %c0_19] : memref<128x128xf32, #tpu.memory_space<vmem>>, vector<128x128xf32>
    %cst_20 = arith.constant dense<0.000000e+00> : vector<16x128xf32>
    %42 = tpu.matmul %40, %41, %cst_20 {dimension_numbers = #tpu.dot_dimension_numbers<[1], [0], [0], [1], [0, 0, 1, 1], [], []>} : vector<16x128xf32>, vector<128x128xf32>, vector<16x128xf32> -> vector<16x128xf32>
    %c0_21 = arith.constant 0 : index
    %c0_22 = arith.constant 0 : index
    %43 = vector.load %arg7[%c0_21, %c0_22] : memref<1x128xf32, #tpu.memory_space<vmem>>, vector<1x128xf32>
    %44 = vector.broadcast %43 : vector<1x128xf32> to vector<16x128xf32>
    %45 = arith.addf %42, %44 : vector<16x128xf32>
    %c0_23 = arith.constant 0 : index
    %c0_24 = arith.constant 0 : index
    %46 = vector.load %arg8[%c0_23, %c0_24] : memref<16x128xf32, #tpu.memory_space<vmem>>, vector<16x128xf32>
    tpu.vector_store %arg8[%c0_23, %c0_24], %45 {strides = array<i32>} : memref<16x128xf32, #tpu.memory_space<vmem>>, vector<16x128xf32>,
    return
  }
  func.func @transform_0(%arg0: i32) -> (i32, i32) {
    %c0_i32 = arith.constant 0 : i32
    %c0_i32_0 = arith.constant 0 : i32
    return %arg0, %c0_i32 : i32, i32
  }
  func.func @transform_1(%arg0: i32) -> (i32, i32) {
    %c0_i32 = arith.constant 0 : i32
    %c0_i32_0 = arith.constant 0 : i32
    %c0_i32_1 = arith.constant 0 : i32
    return %c0_i32, %c0_i32_0 : i32, i32
  }
  func.func @transform_2(%arg0: i32) -> (i32, i32) {
    %c0_i32 = arith.constant 0 : i32
    %c0_i32_0 = arith.constant 0 : i32
    %c0_i32_1 = arith.constant 0 : i32
    return %c0_i32, %c0_i32_0 : i32, i32
  }
  func.func @transform_3(%arg0: i32) -> (i32, i32) {
    %c0_i32 = arith.constant 0 : i32
    %c0_i32_0 = arith.constant 0 : i32
    %c0_i32_1 = arith.constant 0 : i32
    return %c0_i32, %c0_i32_0 : i32, i32
  }
  func.func @transform_4(%arg0: i32) -> (i32, i32) {
    %c0_i32 = arith.constant 0 : i32
    %c0_i32_0 = arith.constant 0 : i32
    %c0_i32_1 = arith.constant 0 : i32
    return %c0_i32, %c0_i32_0 : i32, i32
  }
  func.func @transform_5(%arg0: i32) -> (i32, i32) {
    %c0_i32 = arith.constant 0 : i32
    %c0_i32_0 = arith.constant 0 : i32
    %c0_i32_1 = arith.constant 0 : i32
    return %c0_i32, %c0_i32_0 : i32, i32
  }
  func.func @transform_6(%arg0: i32) -> (i32, i32) {
    %c0_i32 = arith.constant 0 : i32
    %c0_i32_0 = arith.constant 0 : i32
    %c0_i32_1 = arith.constant 0 : i32
    return %c0_i32, %c0_i32_0 : i32, i32
  }
  func.func @transform_7(%arg0: i32) -> (i32, i32) {
    %c0_i32 = arith.constant 0 : i32
    %c0_i32_0 = arith.constant 0 : i32
    return %arg0, %c0_i32 : i32, i32
  }
}

</mosaic_0001>

<bundles_post_ra>
// kernel: tpu_custom_call.1
= control target key start
LH: loop header
LB: loop body
LE: loop exit
PB: predicated region body
PF: predicated region fallthrough
CT: control target
= control target key end

     0   :  { %12 = vsyncpa [#allocation3], 0  ;;  %s633_s0 = inlined_call_operand.hbm [shape: f32[16,128], index: 0, kind: input, shape index: {}]   ;;  %s634_s1 = inlined_call_operand.hbm [shape: f32[128,128], index: 1, kind: input, shape index: {}]   ;;  %s635_s2 = inlined_call_operand.vmem [shape: f32[1,128], index: 2, kind: input, shape index: {}]   ;;  %s636_s3 = inlined_call_operand.vmem [shape: f32[1,128], index: 3, kind: input, shape index: {}]   ;;  %s637_s4 = inlined_call_operand.vmem [shape: f32[1,128], index: 4, kind: input, shape index: {}]   ;;  %s638_s5 = inlined_call_operand.hbm [shape: f32[128,128], index: 5, kind: input, shape index: {}]   ;;  %s639_s6 = inlined_call_operand.vmem [shape: f32[1,128], index: 6, kind: input, shape index: {}]   ;;  %s640_s7 = inlined_call_operand.hbm [shape: f32[16,128], index: 7, kind: output, shape index: {}]  }
   0x1   :  { %13 = vsyncpa [#allocation6], 0 }
   0x2   :  { %14 = vsyncpa [#allocation4], 0  ;;  %s551_s24 = smov [#allocation5]   ;;  %s552_s26 = smov [#allocation2]  }
   0x3   :  { %s32_s25 = sshll.u32 %s551_s24, 4  ;;  %s20_s27 = sshll.u32 %s552_s26, 4  ;;  %s33_s25 = int_to_ptr.vmem [resolvable:$true] %s32_s25  ;;  %s21_s27 = int_to_ptr.vmem [resolvable:$true] %s20_s27 }
   0x4   :  { %s473_s28 = scalar_lea.vmem %s33_s25, 2048  ;;  %p478_p1 = scmp.lt.s32.totalorder %s33_s25, %s33_s25 }
   0x5   :  { %p474_p0 = scmp.ne.s32.totalorder %s33_s25, %s473_s28  ;;  %p479_p2 = scmp.lt.s32.totalorder %s473_s28, %s473_s28 }
   0x7   :  { %p480_p3 = por %p479_p2, %p478_p1 }
   0x9   :  { %p481_p4 = pnand %p480_p3, %p474_p0 }
   0xb   :  { %484 = shalt.err (!%p481_p4)
}
   0xc   :  { %s553_s29 = smov 128   ;;  %s554_s30 = smov 8  }
   0xd   :  { %38 = dma.hbm_to_vmem [thread:$0]  %s634_s1, 2048, %s33_s25, [#allocation6], %s553_s29, %s553_s29, %s554_s30  }
   0xe   :  { %s493_s10 = scalar_lea.vmem %s21_s27, 256  ;;  %p498_p6 = scmp.lt.s32.totalorder %s21_s27, %s21_s27 }
   0xf   :  { %p494_p5 = scmp.ne.s32.totalorder %s21_s27, %s493_s10  ;;  %p499_p7 = scmp.lt.s32.totalorder %s493_s10, %s493_s10 }
  0x11   :  { %p500_p8 = por %p499_p7, %p498_p6 }
  0x13   :  { %p501_p9 = pnand %p500_p8, %p494_p5 }
  0x15   :  { %504 = shalt.err (!%p501_p9)
}
  0x16   :  { %26 = dma.hbm_to_vmem [thread:$0]  %s633_s0, 256, %s21_s27, [#allocation3], %s553_s29, %s553_s29, %s554_s30  }
  0x17   :  { %s555_s13 = smov [#allocation7]  }
  0x18   :  { %s50_s14 = sshll.u32 %s555_s13, 4  ;;  %s51_s14 = int_to_ptr.vmem [resolvable:$true] %s50_s14 }
  0x19   :  { %s513_s15 = scalar_lea.vmem %s51_s14, 2048  ;;  %p518_p11 = scmp.lt.s32.totalorder %s51_s14, %s51_s14 }
  0x1a   :  { %p514_p10 = scmp.ne.s32.totalorder %s51_s14, %s513_s15  ;;  %p519_p12 = scmp.lt.s32.totalorder %s513_s15, %s513_s15 }
  0x1c   :  { %p520_p13 = por %p519_p12, %p518_p11 }
  0x1e   :  { %p521_p0 = pnand %p520_p13, %p514_p10 }
  0x20   :  { %524 = shalt.err (!%p521_p0)
}
  0x21   :  { %56 = dma.hbm_to_vmem [thread:$0]  %s638_s5, 2048, %s51_s14, [#allocation6], %s553_s29, %s553_s29, %s554_s30  }
  0x22   :  { %545 = dma.done.wait [#allocation3], 256  }
  0x23   :  { %546 = vsyncadd [#allocation3], 4294967040 }
  0x24   :  { %547 = dma.done.wait [#allocation6], 4096  }
  0x25   :  { %548 = vsyncadd [#allocation6], 4294963200  ;;  %v85_v0 = vld [vmem:[#allocation5 + $0x78] sm:$0xff]  ;;  %v84_v1 = vld [vmem:[#allocation5 + $0x70] sm:$0xff]  ;;  %v186_v35 = vlaneseq  ;;  %s556_s22 = smov [#allocation8]  }
  0x26   :  { %381 = vmatprep.subr.mxu0 %v85_v0  ;;  %v83_v2 = vld [vmem:[#allocation5 + $0x68] sm:$0xff]  ;;  %v82_v3 = vld [vmem:[#allocation5 + $0x60] sm:$0xff]  ;;  %v68_v4 = vld [vmem:[#allocation2] sm:$0xff] }
  0x27   :  { %382 = vmatpush3.msra.mxu0 %v85_v0  ;;  %v81_v5 = vld [vmem:[#allocation5 + $0x58] sm:$0xff]  ;;  %413 = vmatprep.mubr.f32.mxu0 %v68_v4  ;;  %v80_v6 = vld [vmem:[#allocation5 + $0x50] sm:$0xff]  ;;  %v79_v7 = vld [vmem:[#allocation5 + $0x48] sm:$0xff]  ;;  %v187_v36 = vand.u32 127, %v186_v35 }
  0x28   :  { %383 = vmatprep.subr.mxu0 %v84_v1  ;;  %v78_v8 = vld [vmem:[#allocation5 + $0x40] sm:$0xff]  ;;  %v77_v9 = vld [vmem:[#allocation5 + $0x38] sm:$0xff]  ;;  %v76_v10 = vld [vmem:[#allocation5 + $0x30] sm:$0xff] }
  0x29   :  { %384 = vmatpush3.msra.mxu0 %v84_v1  ;;  %v75_v11 = vld [vmem:[#allocation5 + $0x28] sm:$0xff]  ;;  %v74_v12 = vld [vmem:[#allocation5 + $0x20] sm:$0xff]  ;;  %v73_v13 = vld [vmem:[#allocation5 + $0x18] sm:$0xff]  ;;  %vm188_vm0 = vcmp.lt.s32.totalorder %v187_v36, 64 }
  0x2a   :  { %385 = vmatprep.subr.mxu0 %v83_v2  ;;  %v72_v14 = vld [vmem:[#allocation5 + $0x10] sm:$0xff]  ;;  %v71_v15 = vld [vmem:[#allocation5 + $0x8] sm:$0xff]  ;;  %v70_v16 = vld [vmem:[#allocation5] sm:$0xff] }
  0x2b   :  { %386 = vmatpush3.msra.mxu0 %v83_v2  ;;  %v69_v17 = vld [vmem:[#allocation2 + $0x8] sm:$0xff]  ;;  %v341_v18 = vld [vmem:[%s635_s2] ss:$0 sm:$0xff]  ;;  %v236_v47 = vld [vmem:[#allocation7 + $0x68] sm:$0xff] }
  0x2c   :  { %387 = vmatprep.subr.mxu0 %v82_v3  ;;  %v238_v33 = vld [vmem:[#allocation7 + $0x78] sm:$0xff]  ;;  %v237_v34 = vld [vmem:[#allocation7 + $0x70] sm:$0xff]  ;;  %v235_v48 = vld [vmem:[#allocation7 + $0x60] sm:$0xff] }
  0x2d   :  { %388 = vmatpush3.msra.mxu0 %v82_v3  ;;  %416 = vmatprep.subr.mxu1 %v238_v33  ;;  %v234_v49 = vld [vmem:[#allocation7 + $0x58] sm:$0xff]  ;;  %v233_v50 = vld [vmem:[#allocation7 + $0x50] sm:$0xff]  ;;  %v232_v51 = vld [vmem:[#allocation7 + $0x48] sm:$0xff] }
  0x2e   :  { %389 = vmatprep.subr.mxu0 %v81_v5  ;;  %417 = vmatpush3.msra.mxu1 %v238_v33  ;;  %v231_v52 = vld [vmem:[#allocation7 + $0x40] sm:$0xff]  ;;  %v230_v53 = vld [vmem:[#allocation7 + $0x38] sm:$0xff]  ;;  %v229_v54 = vld [vmem:[#allocation7 + $0x30] sm:$0xff] }
  0x2f   :  { %390 = vmatpush3.msra.mxu0 %v81_v5  ;;  %418 = vmatprep.subr.mxu1 %v237_v34  ;;  %v228_v55 = vld [vmem:[#allocation7 + $0x28] sm:$0xff]  ;;  %v227_v56 = vld [vmem:[#allocation7 + $0x20] sm:$0xff]  ;;  %v226_v57 = vld [vmem:[#allocation7 + $0x18] sm:$0xff] }
  0x30   :  { %391 = vmatprep.subr.mxu0 %v80_v6  ;;  %419 = vmatpush3.msra.mxu1 %v237_v34  ;;  %v225_v58 = vld [vmem:[#allocation7 + $0x10] sm:$0xff]  ;;  %v224_v59 = vld [vmem:[#allocation7 + $0x8] sm:$0xff]  ;;  %v223_v60 = vld [vmem:[#allocation7] sm:$0xff] }
  0x31   :  { %392 = vmatpush3.msra.mxu0 %v80_v6  ;;  %420 = vmatprep.subr.mxu1 %v236_v47  ;;  %v342_v4 = vld [vmem:[%s636_s3] ss:$0 sm:$0xff]  ;;  %s328_s3 = sshll.u32 %s556_s22, 4  ;;  %s329_s3 = int_to_ptr.vmem [resolvable:$true] %s328_s3 }
  0x32   :  { %393 = vmatprep.subr.mxu0 %v79_v7  ;;  %421 = vmatpush3.msra.mxu1 %v236_v47  ;;  %v343_v6 = vld [vmem:[%s637_s4] ss:$0 sm:$0xff]  ;;  %s525_s4 = scalar_lea.vmem %s329_s3, 256  ;;  %p530_p2 = scmp.lt.s32.totalorder %s329_s3, %s329_s3 }
  0x33   :  { %394 = vmatpush3.msra.mxu0 %v79_v7  ;;  %422 = vmatprep.subr.mxu1 %v235_v48  ;;  %p526_p1 = scmp.ne.s32.totalorder %s329_s3, %s525_s4  ;;  %p531_p3 = scmp.lt.s32.totalorder %s525_s4, %s525_s4 }
  0x34   :  { %395 = vmatprep.subr.mxu0 %v78_v8  ;;  %423 = vmatpush3.msra.mxu1 %v235_v48 }
  0x35   :  { %396 = vmatpush3.msra.mxu0 %v78_v8  ;;  %424 = vmatprep.subr.mxu1 %v234_v49  ;;  %p532_p4 = por %p531_p3, %p530_p2 }
  0x36   :  { %397 = vmatprep.subr.mxu0 %v77_v9  ;;  %425 = vmatpush3.msra.mxu1 %v234_v49 }
  0x37   :  { %398 = vmatpush3.msra.mxu0 %v77_v9  ;;  %426 = vmatprep.subr.mxu1 %v233_v50  ;;  %p533_p5 = pnand %p532_p4, %p526_p1 }
  0x38   :  { %399 = vmatprep.subr.mxu0 %v76_v10  ;;  %427 = vmatpush3.msra.mxu1 %v233_v50 }
  0x39   :  { %400 = vmatpush3.msra.mxu0 %v76_v10  ;;  %428 = vmatprep.subr.mxu1 %v232_v51 }
  0x3a   :  { %401 = vmatprep.subr.mxu0 %v75_v11  ;;  %429 = vmatpush3.msra.mxu1 %v232_v51 }
  0x3b   :  { %402 = vmatpush3.msra.mxu0 %v75_v11  ;;  %430 = vmatprep.subr.mxu1 %v231_v52 }
  0x3c   :  { %403 = vmatprep.subr.mxu0 %v74_v12  ;;  %431 = vmatpush3.msra.mxu1 %v231_v52 }
  0x3d   :  { %404 = vmatpush3.msra.mxu0 %v74_v12  ;;  %432 = vmatprep.subr.mxu1 %v230_v53 }
  0x3e   :  { %405 = vmatprep.subr.mxu0 %v73_v13  ;;  %433 = vmatpush3.msra.mxu1 %v230_v53 }
  0x3f   :  { %406 = vmatpush3.msra.mxu0 %v73_v13  ;;  %434 = vmatprep.subr.mxu1 %v229_v54  ;;  %v344_v13 = vld [vmem:[%s639_s6] ss:$0 sm:$0xff] }
  0x40   :  { %407 = vmatprep.subr.mxu0 %v72_v14  ;;  %435 = vmatpush3.msra.mxu1 %v229_v54 }
  0x41   :  { %408 = vmatpush3.msra.mxu0 %v72_v14  ;;  %436 = vmatprep.subr.mxu1 %v228_v55 }
  0x42   :  { %409 = vmatprep.subr.mxu0 %v71_v15  ;;  %437 = vmatpush3.msra.mxu1 %v228_v55 }
  0x43   :  { %410 = vmatpush3.msra.mxu0 %v71_v15  ;;  %438 = vmatprep.subr.mxu1 %v227_v56 }
  0x44   :  { %411 = vmatprep.subr.mxu0 %v70_v16  ;;  %439 = vmatpush3.msra.mxu1 %v227_v56 }
  0x45   :  { %412 = vmatpush3.msra.mxu0 %v70_v16  ;;  %440 = vmatprep.subr.mxu1 %v226_v57 }
  0x46   :  { %414 = vmatmul.mubr.f32.vlgmr.msra.gmra.mxu0 %v69_v17  ;;  %441 = vmatpush3.msra.mxu1 %v226_v57 }
  0x47   :  { %442 = vmatprep.subr.mxu1 %v225_v58 }
  0x48   :  { %443 = vmatpush3.msra.mxu1 %v225_v58 }
  0x49   :  { %444 = vmatprep.subr.mxu1 %v224_v59 }
  0x4a   :  { %445 = vmatpush3.msra.mxu1 %v224_v59 }
  0x4b   :  { %446 = vmatprep.subr.mxu1 %v223_v60 }
  0x4c   :  { %447 = vmatpush3.msra.mxu1 %v223_v60 }
 0x106   :  { %v415_v19 = vpop.f32.mrf.mxu0 }
 0x107   :  { %v165_v20 = vadd.f32 %v415_v19, %v341_v18 }
 0x108   :  { %v159_v21 = vpop.f32.mrf.mxu0 }
 0x109   :  { %v171_v22 = vmul.f32 0.70710677, %v165_v20  ;;  %v160_v23 = vadd.f32 %v341_v18, %v159_v21  ;;  %v169_v31 = vmul.f32 0.5, %v165_v20 }
 0x10b   :  { %v170_v24 = vmul.f32 0.70710677, %v160_v23  ;;  %457 = verf.f32 %v171_v22  ;;  %v168_v27 = vmul.f32 0.5, %v160_v23 }
 0x10d   :  { %459 = verf.f32 %v170_v24 }
 0x118   :  { %v458_v25 = vpop.eup %457 }
 0x119   :  { %v175_v30 = vadd.f32 1.0, %v458_v25 }
 0x11a   :  { %v460_v26 = vpop.eup %459 }
 0x11b   :  { %v174_v28 = vadd.f32 1.0, %v460_v26  ;;  %v177_v32 = vmul.f32 %v175_v30, %v169_v31 }
 0x11d   :  { %v176_v29 = vmul.f32 %v174_v28, %v168_v27 }
 0x11f   :  { %178 = vadd.xlane.f32.xlu0 %v176_v29 }
 0x123   :  { %180 = vadd.xlane.f32.xlu0 %v177_v32 }
 0x1a8   :  { %v179_v37 = vpop.xlane.xlu0 %178 }
 0x1a9   :  { %v182_v38 = vmul.f32 0.015625, %v179_v37 }
 0x1ab   :  { %v184_v39 = vsub.f32 %v176_v29, %v182_v38 }
 0x1ac   :  { %v181_v40 = vpop.xlane.xlu0 %180 }
 0x1ad   :  { %v183_v41 = vmul.f32 0.015625, %v181_v40  ;;  %v189_v42 = vsel %vm188_vm0, %v184_v39, 0.0 }
 0x1ae   :  { %v191_v43 = vmul.f32 %v189_v42, %v189_v42 }
 0x1af   :  { %v185_v44 = vsub.f32 %v177_v32, %v183_v41 }
 0x1b0   :  { %193 = vadd.xlane.f32.xlu1 %v191_v43 }
 0x1b1   :  { %v190_v45 = vsel %vm188_vm0, %v185_v44, 0.0 }
 0x1b2   :  { %v192_v46 = vmul.f32 %v190_v45, %v190_v45 }
 0x1b4   :  { %195 = vadd.xlane.f32.xlu1 %v192_v46 }
 0x239   :  { %v194_v61 = vpop.xlane.xlu1 %193 }
 0x23a   :  { %v197_v62 = vmul.f32 0.015625, %v194_v61 }
 0x23c   :  { %v199_v63 = vadd.f32 1e-05, %v197_v62 }
 0x23d   :  { %v196_v0 = vpop.xlane.xlu1 %195 }
 0x23e   :  { %461 = vrsqrt.f32 %v199_v63  ;;  %v198_v1 = vmul.f32 0.015625, %v196_v0 }
 0x240   :  { %v200_v2 = vadd.f32 1e-05, %v198_v1 }
 0x242   :  { %463 = vrsqrt.f32 %v200_v2 }
 0x24b   :  { %v462_v3 = vpop.eup %461 }
 0x24c   :  { %v203_v5 = vmul.f32 %v462_v3, %v189_v42 }
 0x24e   :  { %v212_v7 = vmul.f32 %v342_v4, %v203_v5 }
 0x24f   :  { %v464_v8 = vpop.eup %463 }
 0x250   :  { %v204_v9 = vmul.f32 %v464_v8, %v190_v45  ;;  %v221_v10 = vadd.f32 %v343_v6, %v212_v7 }
 0x252   :  { %v213_v11 = vmul.f32 %v342_v4, %v204_v9  ;;  %448 = vmatprep.mubr.f32.mxu1 %v221_v10 }
 0x254   :  { %v222_v12 = vadd.f32 %v343_v6, %v213_v11 }
 0x256   :  { %449 = vmatmul.mubr.f32.vlgmr.msra.gmra.mxu1 %v222_v12 }
 0x316   :  { %v450_v14 = vpop.f32.mrf.mxu1 }
 0x317   :  { %v318_v15 = vadd.f32 %v450_v14, %v344_v13 }
 0x318   :  { %v312_v16 = vpop.f32.mrf.mxu1 }
 0x319   :  { %322 = vst [vmem:[#allocation8 + $0x8] sm:$0xff] %v318_v15  ;;  %v313_v17 = vadd.f32 %v344_v13, %v312_v16 }
 0x31b   :  { %321 = vst [vmem:[#allocation8] sm:$0xff] %v313_v17 }
 0x31c   :  { %536 = shalt.err (!%p533_p5)
}
 0x31d   :  { %334 = dma.vmem_to_hbm [thread:$0]  %s329_s3, 256, %s640_s7, [#allocation4], %s553_s29, %s553_s29, %s554_s30  }
 0x31e   :  { %549 = dma.done.wait [#allocation4], 256  }
 0x31f   :  { %550 = vsyncadd [#allocation4], 4294967040 }
 0x320   :  { %338 = vsyncpa [#allocation3], 1 }
 0x321   :  { %339 = vsyncpa [#allocation6], 1 }
 0x322   :  { %340 = vsyncpa [#allocation4], 1 }

</bundles_post_ra>
